<compile_context>
chip_gen: v7x
topology: tpu7x:2x2x1
jax: 0.10.0
libtpu: 0.0.40
codegen_flags: <defaults>
</compile_context>

<pallas_src>
import inspect

import jax
import jax.numpy as jnp
from jax.experimental import pallas as pl
from jax.experimental.pallas import tpu as pltpu

NEG_INF = -1e30


def _round_up(x, m):
    return ((x + m - 1) // m) * m


# ---------------------------------------------------------------------------
# Kernels (everything after the matmul is f32)
# ---------------------------------------------------------------------------
def _log_softmax_rows(z):
    m = jnp.max(z, axis=-1, keepdims=True)
    s = z - m
    lse = jnp.log(jnp.sum(jnp.exp(s), axis=-1, keepdims=True))
    return s - lse


def _kernel_no_beta(x_ref, w_ref, bm_ref, o_ref):
    # (tb, insize) @ (insize, a_pad) -> (tb, a_pad), f32 accumulation on MXU.
    z = jnp.dot(x_ref[...], w_ref[...], preferred_element_type=jnp.float32)
    z = z + bm_ref[...]                       # bias with -1e30 baked in padded lanes
    o_ref[...] = _log_softmax_rows(z).astype(o_ref.dtype)


def _kernel_scalar_beta(x_ref, w_ref, b_ref, mask_ref, beta_ref, o_ref):
    z = jnp.dot(x_ref[...], w_ref[...], preferred_element_type=jnp.float32)
    z = (z + b_ref[...]) * beta_ref[0, 0]     # scalar beta read from SMEM
    z = z + mask_ref[...]                     # mask applied AFTER the multiply
    o_ref[...] = _log_softmax_rows(z).astype(o_ref.dtype)


def _kernel_row_beta(x_ref, w_ref, b_ref, mask_ref, beta_ref, o_ref):
    z = jnp.dot(x_ref[...], w_ref[...], preferred_element_type=jnp.float32)
    z = (z + b_ref[...]) * beta_ref[...]      # (tb, 1) broadcasts over lanes
    z = z + mask_ref[...]
    o_ref[...] = _log_softmax_rows(z).astype(o_ref.dtype)


# ---------------------------------------------------------------------------
# Parameter prep (do ONCE at init time, not per forward call)
# ---------------------------------------------------------------------------
def prepare_action_head_params(weight, bias, compute_dtype=jnp.bfloat16):
    """Pre-transpose nn.Linear weight and lane-pad num_actions -> mult of 128.

    weight: (num_actions, insize)   bias: (num_actions,)
    """
    num_actions, insize = weight.shape
    a_pad = max(128, _round_up(num_actions, 128))
    w_t = jnp.zeros((insize, a_pad), jnp.float32)
    w_t = w_t.at[:, :num_actions].set(jnp.asarray(weight, jnp.float32).T)
    b = jnp.zeros((1, a_pad), jnp.float32)
    b = b.at[:, :num_actions].set(jnp.asarray(bias, jnp.float32).reshape(1, -1))
    col = jnp.arange(a_pad, dtype=jnp.int32)[None, :]
    mask = jnp.where(col < num_actions, 0.0, NEG_INF).astype(jnp.float32)
    return {
        "w_t": w_t.astype(compute_dtype),   # (insize, a_pad), bf16 -> MXU native
        "bias": b,                          # (1, a_pad) f32 (clean, for beta paths)
        "bias_masked": b + mask,            # (1, a_pad) f32, no-beta fast path
        "mask": mask,                       # (1, a_pad) f32 additive LSE mask
        "num_actions": num_actions,
    }


# ---------------------------------------------------------------------------
# Per-chip VMEM budget / tiling
# ---------------------------------------------------------------------------
def _vmem_capacity_bytes():
    try:
        info = pltpu.get_tpu_info()
        cap = int(getattr(info, "vmem_capacity_bytes", 0))
        if cap > 0:
            return cap
    except Exception:
        pass
    return 64 << 20   # conservative: v7x per-TensorCore VMEM


def _choose_batch_tile(rows, insize, a_pad, *, x_bytes, out_bytes, row_beta,
                       vmem_budget, resident_bytes, tb_max=1024):
    # Per-row VMEM: double-buffered x + out tiles (+ lane-padded beta tile).
    per_row = 2 * insize * x_bytes + 2 * a_pad * out_bytes
    if row_beta:
        per_row += 2 * 128 * 4            # (tb,1) f32 tile lane-pads to (tb,128)
    # Guard the "budget exhausted by resident weight" cliff: never below tb=8.
    avail = max(vmem_budget - resident_bytes, per_row * 8)
    tb = max(8, min(tb_max, (avail // per_row) // 8 * 8))
    if rows > 8:
        # Guarantee >=2 grid steps so both v7x TensorCores get work.
        tb = min(tb, _round_up(pl.cdiv(rows, 2), 8))
    # Refit tb to the actual tile count: last (masked) tile wastes < 8 rows.
    n_tiles = max(1, pl.cdiv(rows, tb))
    tb = _round_up(pl.cdiv(rows, n_tiles), 8)
    return int(tb), int(pl.cdiv(rows, tb))


# ---------------------------------------------------------------------------
# Grid-invariant ("resident") blocks: request single buffering when supported.
# ---------------------------------------------------------------------------
_BUFFERED_RESIDENT_OK = None   # learned lazily; None = not yet probed


def _buffered_supported():
    if not hasattr(pl, "Buffered"):
        return False
    try:
        return "pipeline_mode" in inspect.signature(pl.BlockSpec).parameters
    except (TypeError, ValueError):
        return True


def _resident_spec(shape, single_buffer):
    index_map = lambda i: (0,) * len(shape)
    if single_buffer:
        return pl.BlockSpec(shape, index_map, pipeline_mode=pl.Buffered(1))
    return pl.BlockSpec(shape, index_map)


# ---------------------------------------------------------------------------
# Forward
# ---------------------------------------------------------------------------
def categorical_action_head_forward(x, params, beta=None, *, out_dtype=jnp.float32):
    """logits = log_softmax((x @ W.T + b) * beta, axis=-1).

    x:    (..., insize); cast to the weight compute dtype (bf16 by default).
    beta: None, a scalar, or per-row (broadcastable to x.shape[:-1] + (1,)).
          # TODO(synk): per-action beta of shape (..., num_actions) not supported.
    Returns (..., num_actions) logits in `out_dtype` (f32 matches the PyTorch
    module; pass jnp.bfloat16 to halve the output HBM stream if allowed).
    """
    global _BUFFERED_RESIDENT_OK

    w_t = params["w_t"]
    insize, a_pad = w_t.shape
    num_actions = params["num_actions"]
    lead = x.shape[:-1]
    x2d = x.reshape(-1, insize).astype(w_t.dtype)
    rows = x2d.shape[0]
    if rows == 0:
        return jnp.zeros(lead + (num_actions,), out_dtype)

    # --- beta classification --------------------------------------------
    beta_mode = "none"
    beta_arr = None
    if beta is not None:
        beta_arr = jnp.asarray(beta, dtype=jnp.float32)
        if beta_arr.size == 1:
            beta_mode = "scalar"
            beta_arr = beta_arr.reshape(1, 1)         # SMEM scalar
        else:
            beta_mode = "row"
            if beta_arr.shape == lead:
                beta_arr = beta_arr[..., None]
            beta_arr = jnp.broadcast_to(beta_arr, lead + (1,)).reshape(rows, 1)

    # --- tiling / per-chip VMEM budget ------------------------------------
    x_bytes = jnp.dtype(x2d.dtype).itemsize
    out_bytes = jnp.dtype(out_dtype).itemsize
    w_bytes = jnp.dtype(w_t.dtype).itemsize
    cap = _vmem_capacity_bytes()
    # Worst-case resident footprint (assume double-buffered weight so the
    # Buffered(1) fallback still fits).
    resident = 2 * insize * a_pad * w_bytes + 4 * a_pad * 4
    budget = (cap * 3) // 4
    tb, n_tiles = _choose_batch_tile(
        rows, insize, a_pad, x_bytes=x_bytes, out_bytes=out_bytes,
        row_beta=(beta_mode == "row"), vmem_budget=budget,
        resident_bytes=resident)
    grid = (n_tiles,)

    vmem_per_step = (2 * tb * insize * x_bytes + 2 * tb * a_pad * out_bytes
                     + resident
                     + (2 * tb * 128 * 4 if beta_mode == "row" else 0))
    vmem_limit = int(min(max(vmem_per_step + (8 << 20), 32 << 20),
                         cap - (4 << 20)))
    compiler_params = pltpu.CompilerParams(
        dimension_semantics=("parallel",),   # v7x: both TCs split batch tiles
        vmem_limit_bytes=vmem_limit,
    )

    out_shape = jax.ShapeDtypeStruct((rows, a_pad), out_dtype)
    x_spec = pl.BlockSpec((tb, insize), lambda i: (i, 0))
    o_spec = pl.BlockSpec((tb, a_pad), lambda i: (i, 0))

    def launch(single_buffer):
        w_spec = _resident_spec((insize, a_pad), single_buffer)
        if beta_mode == "none":
            bm_spec = _resident_spec((1, a_pad), single_buffer)
            return pl.pallas_call(
                _kernel_no_beta, out_shape=out_shape, grid=grid,
                in_specs=[x_spec, w_spec, bm_spec],
                out_specs=o_spec, compiler_params=compiler_params,
            )(x2d, w_t, params["bias_masked"])
        b_spec = _resident_spec((1, a_pad), single_buffer)
        m_spec = _resident_spec((1, a_pad), single_buffer)
        if beta_mode == "scalar":
            beta_spec = pl.BlockSpec(memory_space=pltpu.MemorySpace.SMEM)
            return pl.pallas_call(
                _kernel_scalar_beta, out_shape=out_shape, grid=grid,
                in_specs=[x_spec, w_spec, b_spec, m_spec, beta_spec],
                out_specs=o_spec, compiler_params=compiler_params,
            )(x2d, w_t, params["bias"], params["mask"], beta_arr)
        beta_spec = pl.BlockSpec((tb, 1), lambda i: (i, 0))
        return pl.pallas_call(
            _kernel_row_beta, out_shape=out_shape, grid=grid,
            in_specs=[x_spec, w_spec, b_spec, m_spec, beta_spec],
            out_specs=o_spec, compiler_params=compiler_params,
        )(x2d, w_t, params["bias"], params["mask"], beta_arr)

    if _BUFFERED_RESIDENT_OK is None:
        _BUFFERED_RESIDENT_OK = _buffered_supported()
    if _BUFFERED_RESIDENT_OK:
        try:
            logits_pad = launch(True)
        except Exception:
            _BUFFERED_RESIDENT_OK = False   # this JAX rejects Buffered(1); retry
            logits_pad = launch(False)
    else:
        logits_pad = launch(False)

    # Slice lane padding only when it exists (no extra pass if A % 128 == 0).
    logits = logits_pad if a_pad == num_actions else logits_pad[:, :num_actions]
    return logits.reshape(lead + (num_actions,))


# ---------------------------------------------------------------------------
# Deterministic orthogonal init (matches torch.nn.init.orthogonal_ semantics)
# ---------------------------------------------------------------------------
def orthogonal_init(key, rows, cols, gain):
    transpose = rows < cols
    shape = (cols, rows) if transpose else (rows, cols)
    a = jax.random.normal(key, shape, dtype=jnp.float32)
    q, r = jnp.linalg.qr(a)
    q = q * jnp.sign(jnp.diagonal(r))[None, :]
    if transpose:
        q = q.T
    return gain * q  # (rows, cols)


if __name__ == "__main__":
    key = jax.random.PRNGKey(0)
    k_w, k_x, k_beta, k_x3 = jax.random.split(key, 4)

    batch, insize, num_actions, init_scale = 8, 32, 16, 0.01

    # nn.Linear(insize, num_actions) with orthogonal_ weight / zero bias.
    weight = orthogonal_init(k_w, num_actions, insize, gain=init_scale)  # (A, insize)
    bias = jnp.zeros((num_actions,), dtype=jnp.float32)
    params = prepare_action_head_params(weight, bias)                    # once

    x = jax.random.normal(k_x, (batch, insize), dtype=jnp.float32)

    # 1) beta=None path.
    logits = categorical_action_head_forward(x, params)
    jax.block_until_ready(logits)

    # 2) scalar beta (rides in SMEM, no materialized (rows,1) array).
    beta_s = 0.7
    logits_s = categorical_action_head_forward(x, params, beta=beta_s)
    jax.block_until_ready(logits_s)

    # 3) per-row beta.
    beta_r = jax.random.uniform(k_beta, (batch, 1), dtype=jnp.float32) + 0.5
    logits_r = categorical_action_head_forward(x, params, beta=beta_r)
    jax.block_until_ready(logits_r)

    # 4) higher-rank input, ragged flattened batch (15 rows -> 2 masked tiles).
    x3 = jax.random.normal(k_x3, (3, 5, insize), dtype=jnp.float32)
    logits3 = categorical_action_head_forward(x3, params)
    jax.block_until_ready(logits3)

    # Pure-JAX f32 references (kernel matmul runs in bf16 -> bf16-sized tol).
    z = x @ weight.T + bias
    ref = jax.nn.log_softmax(z, axis=-1)
    ref_s = jax.nn.log_softmax(z * beta_s, axis=-1)
    ref_r = jax.nn.log_softmax(z * beta_r, axis=-1)
    ref3 = jax.nn.log_softmax(x3 @ weight.T + bias, axis=-1)

    assert logits.shape == (batch, num_actions)
    assert logits3.shape == (3, 5, num_actions)
    tol = 5e-3
    assert jnp.allclose(logits, ref, atol=tol), "mismatch vs reference (beta=None)"
    assert jnp.allclose(logits_s, ref_s, atol=tol), "mismatch vs reference (scalar beta)"
    assert jnp.allclose(logits_r, ref_r, atol=tol), "mismatch vs reference (per-row beta)"
    assert jnp.allclose(logits3, ref3, atol=tol), "mismatch vs reference (3-D input)"
    assert jnp.allclose(jnp.sum(jnp.exp(logits), axis=-1), 1.0, atol=1e-4)
    assert jnp.allclose(jnp.sum(jnp.exp(logits3), axis=-1), 1.0, atol=1e-4)

    print("KERNEL_OK")
</pallas_src>

<mosaic_0001>
module attributes {stable_mosaic.version = 11 : i64} {
  func.func @_kernel_no_beta(%arg0: i32, %arg1: memref<8x32xbf16, #tpu.memory_space<vmem>>, %arg2: memref<32x128xbf16, #tpu.memory_space<vmem>>, %arg3: memref<1x128xf32, #tpu.memory_space<vmem>>, %arg4: memref<8x128xf32, #tpu.memory_space<vmem>>) attributes {dimension_semantics = [#tpu.dimension_semantics<parallel>], iteration_bounds = array<i64: 1>, scalar_prefetch = 0 : i64, scratch_operands = 0 : i64, tpu.core_type = #tpu.core_type<tc>, window_params = [{transform_indices = @transform_0, window_bounds = array<i64: 8, 32>}, {pipeline_mode = #tpu.pipeline_mode<synchronous>, transform_indices = @transform_1, window_bounds = array<i64: 32, 128>}, {pipeline_mode = #tpu.pipeline_mode<synchronous>, transform_indices = @transform_2, window_bounds = array<i64: 1, 128>}, {transform_indices = @transform_3, window_bounds = array<i64: 8, 128>}]} {
    %c0 = arith.constant 0 : index
    %c0_0 = arith.constant 0 : index
    %0 = vector.load %arg1[%c0, %c0_0] : memref<8x32xbf16, #tpu.memory_space<vmem>>, vector<8x32xbf16>
    %c0_1 = arith.constant 0 : index
    %c0_2 = arith.constant 0 : index
    %1 = vector.load %arg2[%c0_1, %c0_2] : memref<32x128xbf16, #tpu.memory_space<vmem>>, vector<32x128xbf16>
    %cst = arith.constant dense<0.000000e+00> : vector<8x128xf32>
    %2 = tpu.matmul %0, %1, %cst {dimension_numbers = #tpu.dot_dimension_numbers<[1], [0], [0], [1], [0, 0, 1, 1], [], []>} : vector<8x32xbf16>, vector<32x128xbf16>, vector<8x128xf32> -> vector<8x128xf32>
    %c0_3 = arith.constant 0 : index
    %c0_4 = arith.constant 0 : index
    %3 = vector.load %arg3[%c0_3, %c0_4] : memref<1x128xf32, #tpu.memory_space<vmem>>, vector<1x128xf32>
    %4 = vector.broadcast %3 : vector<1x128xf32> to vector<8x128xf32>
    %5 = arith.addf %2, %4 : vector<8x128xf32>
    %cst_5 = arith.constant dense<0xFF800000> : vector<8xf32>
    %6 = vector.multi_reduction <maximumf>, %5, %cst_5 [1] : vector<8x128xf32> to vector<8xf32>
    %7 = vector.shape_cast %6 : vector<8xf32> to vector<8x1xf32>
    %8 = vector.broadcast %7 : vector<8x1xf32> to vector<8x128xf32>
    %9 = arith.subf %5, %8 : vector<8x128xf32>
    %10 = math.exp %9 : vector<8x128xf32>
    %cst_6 = arith.constant dense<0.000000e+00> : vector<8xf32>
    %11 = vector.multi_reduction <add>, %10, %cst_6 [1] : vector<8x128xf32> to vector<8xf32>
    %12 = vector.shape_cast %11 : vector<8xf32> to vector<8x1xf32>
    %13 = math.log %12 : vector<8x1xf32>
    %14 = vector.broadcast %13 : vector<8x1xf32> to vector<8x128xf32>
    %15 = arith.subf %9, %14 : vector<8x128xf32>
    %c0_7 = arith.constant 0 : index
    %c0_8 = arith.constant 0 : index
    %16 = vector.load %arg4[%c0_7, %c0_8] : memref<8x128xf32, #tpu.memory_space<vmem>>, vector<8x128xf32>
    tpu.vector_store %arg4[%c0_7, %c0_8], %15 {strides = array<i32>} : memref<8x128xf32, #tpu.memory_space<vmem>>, vector<8x128xf32>,
    return
  }
  func.func @transform_0(%arg0: i32) -> (i32, i32) {
    %c0_i32 = arith.constant 0 : i32
    %c0_i32_0 = arith.constant 0 : i32
    return %arg0, %c0_i32 : i32, i32
  }
  func.func @transform_1(%arg0: i32) -> (i32, i32) {
    %c0_i32 = arith.constant 0 : i32
    %c0_i32_0 = arith.constant 0 : i32
    %c0_i32_1 = arith.constant 0 : i32
    return %c0_i32, %c0_i32_0 : i32, i32
  }
  func.func @transform_2(%arg0: i32) -> (i32, i32) {
    %c0_i32 = arith.constant 0 : i32
    %c0_i32_0 = arith.constant 0 : i32
    %c0_i32_1 = arith.constant 0 : i32
    return %c0_i32, %c0_i32_0 : i32, i32
  }
  func.func @transform_3(%arg0: i32) -> (i32, i32) {
    %c0_i32 = arith.constant 0 : i32
    %c0_i32_0 = arith.constant 0 : i32
    return %arg0, %c0_i32 : i32, i32
  }
}

module attributes {stable_mosaic.version = 11 : i64} {
  func.func @_kernel_no_beta(%arg0: i32, %arg1: memref<8x32xbf16, #tpu.memory_space<vmem>>, %arg2: memref<32x128xbf16, #tpu.memory_space<vmem>>, %arg3: memref<1x128xf32, #tpu.memory_space<vmem>>, %arg4: memref<8x128xf32, #tpu.memory_space<vmem>>) attributes {dimension_semantics = [#tpu.dimension_semantics<parallel>], iteration_bounds = array<i64: 1>, scalar_prefetch = 0 : i64, scratch_operands = 0 : i64, tpu.core_type = #tpu.core_type<tc>, window_params = [{transform_indices = @transform_0, window_bounds = array<i64: 8, 32>}, {pipeline_mode = #tpu.pipeline_mode<synchronous>, transform_indices = @transform_1, window_bounds = array<i64: 32, 128>}, {pipeline_mode = #tpu.pipeline_mode<synchronous>, transform_indices = @transform_2, window_bounds = array<i64: 1, 128>}, {transform_indices = @transform_3, window_bounds = array<i64: 8, 128>}]} {
    %c0 = arith.constant 0 : index
    %c0_0 = arith.constant 0 : index
    %0 = vector.load %arg1[%c0, %c0_0] : memref<8x32xbf16, #tpu.memory_space<vmem>>, vector<8x32xbf16>
    %c0_1 = arith.constant 0 : index
    %c0_2 = arith.constant 0 : index
    %1 = vector.load %arg2[%c0_1, %c0_2] : memref<32x128xbf16, #tpu.memory_space<vmem>>, vector<32x128xbf16>
    %cst = arith.constant dense<0.000000e+00> : vector<8x128xf32>
    %2 = tpu.matmul %0, %1, %cst {dimension_numbers = #tpu.dot_dimension_numbers<[1], [0], [0], [1], [0, 0, 1, 1], [], []>} : vector<8x32xbf16>, vector<32x128xbf16>, vector<8x128xf32> -> vector<8x128xf32>
    %c0_3 = arith.constant 0 : index
    %c0_4 = arith.constant 0 : index
    %3 = vector.load %arg3[%c0_3, %c0_4] : memref<1x128xf32, #tpu.memory_space<vmem>>, vector<1x128xf32>
    %4 = vector.broadcast %3 : vector<1x128xf32> to vector<8x128xf32>
    %5 = arith.addf %2, %4 : vector<8x128xf32>
    %cst_5 = arith.constant dense<0xFF800000> : vector<8xf32>
    %6 = vector.multi_reduction <maximumf>, %5, %cst_5 [1] : vector<8x128xf32> to vector<8xf32>
    %7 = vector.shape_cast %6 : vector<8xf32> to vector<8x1xf32>
    %8 = vector.broadcast %7 : vector<8x1xf32> to vector<8x128xf32>
    %9 = arith.subf %5, %8 : vector<8x128xf32>
    %10 = math.exp %9 : vector<8x128xf32>
    %cst_6 = arith.constant dense<0.000000e+00> : vector<8xf32>
    %11 = vector.multi_reduction <add>, %10, %cst_6 [1] : vector<8x128xf32> to vector<8xf32>
    %12 = vector.shape_cast %11 : vector<8xf32> to vector<8x1xf32>
    %13 = math.log %12 : vector<8x1xf32>
    %14 = vector.broadcast %13 : vector<8x1xf32> to vector<8x128xf32>
    %15 = arith.subf %9, %14 : vector<8x128xf32>
    %c0_7 = arith.constant 0 : index
    %c0_8 = arith.constant 0 : index
    %16 = vector.load %arg4[%c0_7, %c0_8] : memref<8x128xf32, #tpu.memory_space<vmem>>, vector<8x128xf32>
    tpu.vector_store %arg4[%c0_7, %c0_8], %15 {strides = array<i32>} : memref<8x128xf32, #tpu.memory_space<vmem>>, vector<8x128xf32>,
    return
  }
  func.func @transform_0(%arg0: i32) -> (i32, i32) {
    %c0_i32 = arith.constant 0 : i32
    %c0_i32_0 = arith.constant 0 : i32
    return %arg0, %c0_i32 : i32, i32
  }
  func.func @transform_1(%arg0: i32) -> (i32, i32) {
    %c0_i32 = arith.constant 0 : i32
    %c0_i32_0 = arith.constant 0 : i32
    %c0_i32_1 = arith.constant 0 : i32
    return %c0_i32, %c0_i32_0 : i32, i32
  }
  func.func @transform_2(%arg0: i32) -> (i32, i32) {
    %c0_i32 = arith.constant 0 : i32
    %c0_i32_0 = arith.constant 0 : i32
    %c0_i32_1 = arith.constant 0 : i32
    return %c0_i32, %c0_i32_0 : i32, i32
  }
  func.func @transform_3(%arg0: i32) -> (i32, i32) {
    %c0_i32 = arith.constant 0 : i32
    %c0_i32_0 = arith.constant 0 : i32
    return %arg0, %c0_i32 : i32, i32
  }
}

</mosaic_0001>

<bundles_post_ra>
// kernel: tpu_custom_call.1
= control target key start
LH: loop header
LB: loop body
LE: loop exit
PB: predicated region body
PF: predicated region fallthrough
CT: control target
= control target key end

     0   :  { %8 = vsyncpa [#allocation3], 0  ;;  %s310_s0 = inlined_call_operand.hbm [shape: bf16[8,32], index: 0, kind: input, shape index: {}]   ;;  %s311_s1 = inlined_call_operand.hbm [shape: bf16[32,128], index: 1, kind: input, shape index: {}]   ;;  %s312_s2 = inlined_call_operand.vmem [shape: f32[1,128], index: 2, kind: input, shape index: {}]   ;;  %s313_s3 = inlined_call_operand.hbm [shape: f32[8,128], index: 3, kind: output, shape index: {}]  }
   0x1   :  { %9 = vsyncpa [#allocation6], 0 }
   0x2   :  { %10 = vsyncpa [#allocation4], 0  ;;  %s237_s12 = smov [#allocation2]   ;;  %s238_s14 = smov [#allocation5]  }
   0x3   :  { %s17_s13 = sshll.u32 %s237_s12, 4  ;;  %s26_s15 = sshll.u32 %s238_s14, 4  ;;  %s18_s13 = int_to_ptr.vmem [resolvable:$true] %s17_s13  ;;  %s264_s15 = int_to_ptr.vmem [resolvable:$true] %s26_s15 }
   0x4   :  { %s165_s18 = scalar_lea.hbm %s310_s0, 64 }
   0x5   :  { %p166_p0 = scmp.ne.s32.totalorder %s310_s0, %s165_s18  ;;  %p169_p1 = scmp.lt.u32.totalorder %s165_s18, %s310_s0 }
   0x7   :  { %p171_p2 = pnand %p169_p1, %p166_p0 }
   0x9   :  { %174 = shalt.err (!%p171_p2)
}
   0xa   :  { %s175_s23 = scalar_lea.vmem %s18_s13, 64  ;;  %p180_p4 = scmp.lt.s32.totalorder %s18_s13, %s18_s13 }
   0xb   :  { %p176_p3 = scmp.ne.s32.totalorder %s18_s13, %s175_s23  ;;  %p181_p5 = scmp.lt.s32.totalorder %s175_s23, %s175_s23 }
   0xd   :  { %p182_p6 = por %p181_p5, %p180_p4 }
   0xf   :  { %p183_p7 = pnand %p182_p6, %p176_p3 }
  0x11   :  { %186 = shalt.err (!%p183_p7)
}
  0x12   :  { %20 = dma.hbm_to_vmem [thread:$0]  %s310_s0, 64, %s18_s13, [#allocation3]  }
  0x13   :  { %s187_s28 = scalar_lea.hbm %s311_s1, 256 }
  0x14   :  { %p188_p8 = scmp.ne.s32.totalorder %s311_s1, %s187_s28  ;;  %p191_p9 = scmp.lt.u32.totalorder %s187_s28, %s311_s1 }
  0x16   :  { %p193_p10 = pnand %p191_p9, %p188_p8 }
  0x18   :  { %196 = shalt.err (!%p193_p10)
}
  0x19   :  { %s197_s6 = scalar_lea.vmem %s264_s15, 256  ;;  %p202_p12 = scmp.lt.s32.totalorder %s264_s15, %s264_s15 }
  0x1a   :  { %p198_p11 = scmp.ne.s32.totalorder %s264_s15, %s197_s6  ;;  %p203_p13 = scmp.lt.s32.totalorder %s197_s6, %s197_s6 }
  0x1c   :  { %p204_p0 = por %p203_p13, %p202_p12 }
  0x1e   :  { %p205_p1 = pnand %p204_p0, %p198_p11 }
  0x20   :  { %208 = shalt.err (!%p205_p1)
}
  0x21   :  { %s239_s0 = smov 64   ;;  %s240_s7 = smov 4  }
  0x22   :  { %32 = dma.hbm_to_vmem [thread:$0]  %s311_s1, 256, %s264_s15, [#allocation6], %s239_s0, %s239_s0, %s240_s7  }
  0x23   :  { %231 = dma.done.wait [#allocation3], 64  }
  0x24   :  { %232 = vsyncadd [#allocation3], 4294967232 }
  0x25   :  { %233 = dma.done.wait [#allocation6], 256  }
  0x26   :  { %234 = vsyncadd [#allocation6], 4294967040  ;;  %v241_v0 = vmov 0.0   ;;  %vm242_vm0 = vmmov 0   ;;  %v159_v1 = vld [vmem:[#allocation5] sm:$0xff]   ;;  %v160_v2 = vld [vmem:[#allocation5 + $0x8] sm:$0xff]  }
  0x27   :  { %144 = vmatprep.subr.bf16.mxu0 %v241_v0  ;;  %148 = vmatprep.mubr.msk.bf16.mxu0 %vm242_vm0, %v241_v0  ;;  %v42_v3 = vld [vmem:[#allocation2] sm:$0xf]  ;;  %vm66_vm1 = vcmask 261120   ;;  %s243_s1 = smov [#allocation7]  }
  0x28   :  { %145 = vmatpush3.bf16.msra.mxu0 %v159_v1  ;;  %v137_v4 = vld [vmem:[%s312_s2] ss:$0 sm:$0xff]  ;;  %s127_s12 = sshll.u32 %s243_s1, 4  ;;  %s128_s12 = int_to_ptr.vmem [resolvable:$true] %s127_s12 }
  0x29   :  { %146 = vmatprep.subr.bf16.mxu0 %v241_v0  ;;  %s209_s2 = scalar_lea.vmem %s128_s12, 128  ;;  %p214_p3 = scmp.lt.s32.totalorder %s128_s12, %s128_s12 }
  0x2a   :  { %p210_p2 = scmp.ne.s32.totalorder %s128_s12, %s209_s2  ;;  %p215_p4 = scmp.lt.s32.totalorder %s209_s2, %s209_s2 }
  0x2c   :  { %147 = vmatpush3.bf16.msra.mxu0 %v160_v2  ;;  %p216_p5 = por %p215_p4, %p214_p3 }
  0x2e   :  { %p217_p6 = pnand %p216_p5, %p210_p2 }
  0x2f   :  { %149 = vmatmul.mubr.msk.bf16.vlgmr.msra.gmra.mrb[0].mxu0 %vm66_vm1, %v42_v3 }
 0x102   :  { %v104_v5 = vpop.f32.mrb[0].mxu0 }
 0x103   :  { %v105_v6 = vadd.f32 %v137_v4, %v104_v5  ;;  %v150_v7 = vpop.f32.mrb[1].mxu0 }
 0x104   :  { %v107_v8 = vpop.f32.mrb[2].mxu0 }
 0x105   :  { %110 = vmax.xlane.f32.xlu0 %v105_v6  ;;  %v151_v9 = vpop.f32.mrb[3].mxu0 }
 0x192   :  { %v111_v10 = vpop.xlane.xlu0 %110 }
 0x193   :  { %v112_v11 = vsub.f32 %v105_v6, %v111_v10 }
 0x195   :  { %v113_v12 = vmul.f32 1.442695, %v112_v11 }
 0x197   :  { %161 = vpow2.f32 %v113_v12 }
 0x1a1   :  { %v162_v13 = vpop.eup %161 }
 0x1a2   :  { %115 = vadd.xlane.f32.xlu0 %v162_v13 }
 0x22f   :  { %v116_v14 = vpop.xlane.xlu0 %115 }
 0x230   :  { %163 = vlog2.f32 %v116_v14 }
 0x23a   :  { %v164_v15 = vpop.eup %163 }
 0x23b   :  { %v118_v16 = vmul.f32 0.6931472, %v164_v15 }
 0x23d   :  { %v119_v17 = vsub.f32 %v112_v11, %v118_v16 }
 0x23f   :  { %120 = vst [vmem:[#allocation7] sm:$0xff] %v119_v17 }
 0x240   :  { %220 = shalt.err (!%p217_p6)
}
 0x241   :  { %s221_s15 = scalar_lea.hbm %s313_s3, 128 }
 0x242   :  { %p222_p7 = scmp.ne.s32.totalorder %s313_s3, %s221_s15  ;;  %p225_p8 = scmp.lt.u32.totalorder %s221_s15, %s313_s3 }
 0x244   :  { %p227_p9 = pnand %p225_p8, %p222_p7 }
 0x246   :  { %230 = shalt.err (!%p227_p9)
}
 0x247   :  { %130 = dma.vmem_to_hbm [thread:$0]  %s128_s12, 128, %s313_s3, [#allocation4]  }
 0x248   :  { %235 = dma.done.wait [#allocation4], 128  }
 0x249   :  { %236 = vsyncadd [#allocation4], 4294967168 }
 0x24a   :  { %134 = vsyncpa [#allocation3], 1 }
 0x24b   :  { %135 = vsyncpa [#allocation6], 1 }
 0x24c   :  { %136 = vsyncpa [#allocation4], 1 }

// kernel: tpu_custom_call.1
= control target key start
LH: loop header
LB: loop body
LE: loop exit
PB: predicated region body
PF: predicated region fallthrough
CT: control target
= control target key end

     0   :  { %8 = vsyncpa [#allocation3], 0  ;;  %s310_s0 = inlined_call_operand.hbm [shape: bf16[8,32], index: 0, kind: input, shape index: {}]   ;;  %s311_s1 = inlined_call_operand.hbm [shape: bf16[32,128], index: 1, kind: input, shape index: {}]   ;;  %s312_s2 = inlined_call_operand.vmem [shape: f32[1,128], index: 2, kind: input, shape index: {}]   ;;  %s313_s3 = inlined_call_operand.hbm [shape: f32[8,128], index: 3, kind: output, shape index: {}]  }
   0x1   :  { %9 = vsyncpa [#allocation6], 0 }
   0x2   :  { %10 = vsyncpa [#allocation4], 0  ;;  %s237_s12 = smov [#allocation2]   ;;  %s238_s14 = smov [#allocation5]  }
   0x3   :  { %s17_s13 = sshll.u32 %s237_s12, 4  ;;  %s26_s15 = sshll.u32 %s238_s14, 4  ;;  %s18_s13 = int_to_ptr.vmem [resolvable:$true] %s17_s13  ;;  %s264_s15 = int_to_ptr.vmem [resolvable:$true] %s26_s15 }
   0x4   :  { %s165_s18 = scalar_lea.hbm %s310_s0, 64 }
   0x5   :  { %p166_p0 = scmp.ne.s32.totalorder %s310_s0, %s165_s18  ;;  %p169_p1 = scmp.lt.u32.totalorder %s165_s18, %s310_s0 }
   0x7   :  { %p171_p2 = pnand %p169_p1, %p166_p0 }
   0x9   :  { %174 = shalt.err (!%p171_p2)
}
   0xa   :  { %s175_s23 = scalar_lea.vmem %s18_s13, 64  ;;  %p180_p4 = scmp.lt.s32.totalorder %s18_s13, %s18_s13 }
   0xb   :  { %p176_p3 = scmp.ne.s32.totalorder %s18_s13, %s175_s23  ;;  %p181_p5 = scmp.lt.s32.totalorder %s175_s23, %s175_s23 }
   0xd   :  { %p182_p6 = por %p181_p5, %p180_p4 }
   0xf   :  { %p183_p7 = pnand %p182_p6, %p176_p3 }
  0x11   :  { %186 = shalt.err (!%p183_p7)
}
  0x12   :  { %20 = dma.hbm_to_vmem [thread:$0]  %s310_s0, 64, %s18_s13, [#allocation3]  }
  0x13   :  { %s187_s28 = scalar_lea.hbm %s311_s1, 256 }
  0x14   :  { %p188_p8 = scmp.ne.s32.totalorder %s311_s1, %s187_s28  ;;  %p191_p9 = scmp.lt.u32.totalorder %s187_s28, %s311_s1 }
  0x16   :  { %p193_p10 = pnand %p191_p9, %p188_p8 }
  0x18   :  { %196 = shalt.err (!%p193_p10)
}
  0x19   :  { %s197_s6 = scalar_lea.vmem %s264_s15, 256  ;;  %p202_p12 = scmp.lt.s32.totalorder %s264_s15, %s264_s15 }
  0x1a   :  { %p198_p11 = scmp.ne.s32.totalorder %s264_s15, %s197_s6  ;;  %p203_p13 = scmp.lt.s32.totalorder %s197_s6, %s197_s6 }
  0x1c   :  { %p204_p0 = por %p203_p13, %p202_p12 }
  0x1e   :  { %p205_p1 = pnand %p204_p0, %p198_p11 }
  0x20   :  { %208 = shalt.err (!%p205_p1)
}
  0x21   :  { %s239_s0 = smov 64   ;;  %s240_s7 = smov 4  }
  0x22   :  { %32 = dma.hbm_to_vmem [thread:$0]  %s311_s1, 256, %s264_s15, [#allocation6], %s239_s0, %s239_s0, %s240_s7  }
  0x23   :  { %231 = dma.done.wait [#allocation3], 64  }
  0x24   :  { %232 = vsyncadd [#allocation3], 4294967232 }
  0x25   :  { %233 = dma.done.wait [#allocation6], 256  }
  0x26   :  { %234 = vsyncadd [#allocation6], 4294967040  ;;  %v241_v0 = vmov 0.0   ;;  %vm242_vm0 = vmmov 0   ;;  %v159_v1 = vld [vmem:[#allocation5] sm:$0xff]   ;;  %v160_v2 = vld [vmem:[#allocation5 + $0x8] sm:$0xff]  }
  0x27   :  { %144 = vmatprep.subr.bf16.mxu0 %v241_v0  ;;  %148 = vmatprep.mubr.msk.bf16.mxu0 %vm242_vm0, %v241_v0  ;;  %v42_v3 = vld [vmem:[#allocation2] sm:$0xf]  ;;  %vm66_vm1 = vcmask 261120   ;;  %s243_s1 = smov [#allocation7]  }
  0x28   :  { %145 = vmatpush3.bf16.msra.mxu0 %v159_v1  ;;  %v137_v4 = vld [vmem:[%s312_s2] ss:$0 sm:$0xff]  ;;  %s127_s12 = sshll.u32 %s243_s1, 4  ;;  %s128_s12 = int_to_ptr.vmem [resolvable:$true] %s127_s12 }
  0x29   :  { %146 = vmatprep.subr.bf16.mxu0 %v241_v0  ;;  %s209_s2 = scalar_lea.vmem %s128_s12, 128  ;;  %p214_p3 = scmp.lt.s32.totalorder %s128_s12, %s128_s12 }
  0x2a   :  { %p210_p2 = scmp.ne.s32.totalorder %s128_s12, %s209_s2  ;;  %p215_p4 = scmp.lt.s32.totalorder %s209_s2, %s209_s2 }
  0x2c   :  { %147 = vmatpush3.bf16.msra.mxu0 %v160_v2  ;;  %p216_p5 = por %p215_p4, %p214_p3 }
  0x2e   :  { %p217_p6 = pnand %p216_p5, %p210_p2 }
  0x2f   :  { %149 = vmatmul.mubr.msk.bf16.vlgmr.msra.gmra.mrb[0].mxu0 %vm66_vm1, %v42_v3 }
 0x102   :  { %v104_v5 = vpop.f32.mrb[0].mxu0 }
 0x103   :  { %v105_v6 = vadd.f32 %v137_v4, %v104_v5  ;;  %v150_v7 = vpop.f32.mrb[1].mxu0 }
 0x104   :  { %v107_v8 = vpop.f32.mrb[2].mxu0 }
 0x105   :  { %110 = vmax.xlane.f32.xlu0 %v105_v6  ;;  %v151_v9 = vpop.f32.mrb[3].mxu0 }
 0x192   :  { %v111_v10 = vpop.xlane.xlu0 %110 }
 0x193   :  { %v112_v11 = vsub.f32 %v105_v6, %v111_v10 }
 0x195   :  { %v113_v12 = vmul.f32 1.442695, %v112_v11 }
 0x197   :  { %161 = vpow2.f32 %v113_v12 }
 0x1a1   :  { %v162_v13 = vpop.eup %161 }
 0x1a2   :  { %115 = vadd.xlane.f32.xlu0 %v162_v13 }
 0x22f   :  { %v116_v14 = vpop.xlane.xlu0 %115 }
 0x230   :  { %163 = vlog2.f32 %v116_v14 }
 0x23a   :  { %v164_v15 = vpop.eup %163 }
 0x23b   :  { %v118_v16 = vmul.f32 0.6931472, %v164_v15 }
 0x23d   :  { %v119_v17 = vsub.f32 %v112_v11, %v118_v16 }
 0x23f   :  { %120 = vst [vmem:[#allocation7] sm:$0xff] %v119_v17 }
 0x240   :  { %220 = shalt.err (!%p217_p6)
}
 0x241   :  { %s221_s15 = scalar_lea.hbm %s313_s3, 128 }
 0x242   :  { %p222_p7 = scmp.ne.s32.totalorder %s313_s3, %s221_s15  ;;  %p225_p8 = scmp.lt.u32.totalorder %s221_s15, %s313_s3 }
 0x244   :  { %p227_p9 = pnand %p225_p8, %p222_p7 }
 0x246   :  { %230 = shalt.err (!%p227_p9)
}
 0x247   :  { %130 = dma.vmem_to_hbm [thread:$0]  %s128_s12, 128, %s313_s3, [#allocation4]  }
 0x248   :  { %235 = dma.done.wait [#allocation4], 128  }
 0x249   :  { %236 = vsyncadd [#allocation4], 4294967168 }
 0x24a   :  { %134 = vsyncpa [#allocation3], 1 }
 0x24b   :  { %135 = vsyncpa [#allocation6], 1 }
 0x24c   :  { %136 = vsyncpa [#allocation4], 1 }

</bundles_post_ra>
